<compile_context>
chip_gen: v6e
topology: v6e:2x2x1
jax: 0.10.0
libtpu: 0.0.40
codegen_flags: <defaults>
</compile_context>

<pallas_src>
import functools
import math

import jax
import jax.numpy as jnp
from jax import lax
from jax.experimental import pallas as pl
from jax.experimental.pallas import tpu as pltpu

LN_EPS = 1e-5  # torch.nn.LayerNorm default

# Row layout of the packed (8, Dmax) parameter block.
_ROW_BE, _ROW_G1, _ROW_B1, _ROW_G2, _ROW_B2 = 0, 1, 2, 3, 4


def _layernorm(h, gamma, beta):
    mu = jnp.mean(h, axis=-1, keepdims=True)
    var = jnp.mean((h - mu) ** 2, axis=-1, keepdims=True)  # biased, like torch
    return (h - mu) * lax.rsqrt(var + LN_EPS) * gamma + beta


def input_embedding_kernel(
    x_ref,     # (TM, Din)        f32  flattened rows (batch folded into M)
    we_ref,    # (Din, P)         bf16 embedding weight (transposed)
    w1x_ref,   # (Din, Dout)      bf16 linear1 weight rows for the x half
    w1e_ref,   # (P,   Dout)      bf16 linear1 weight rows for the embedding half
    mb_ref,    # (S or TM, Dout)  f32  attn_map @ w1_map + bl1 (not B-replicated)
    pk_ref,    # (8, Dmax)        f32  packed vectors: be, g1, b1, g2, b2
    o_ref,     # (TM, Dout)       output
    *, din, p, dout, mb_reps,
):
    dcat = din + p
    x = x_ref[...]                                           # f32, reused by LN1

    be  = pk_ref[_ROW_BE:_ROW_BE + 1, :p]
    g1x = pk_ref[_ROW_G1:_ROW_G1 + 1, :din]
    g1e = pk_ref[_ROW_G1:_ROW_G1 + 1, din:dcat]
    b1x = pk_ref[_ROW_B1:_ROW_B1 + 1, :din]
    b1e = pk_ref[_ROW_B1:_ROW_B1 + 1, din:dcat]
    g2  = pk_ref[_ROW_G2:_ROW_G2 + 1, :dout]
    b2  = pk_ref[_ROW_B2:_ROW_B2 + 1, :dout]

    # embedding = Linear(input_dim -> P): bf16 operands on the MXU, f32 accum.
    emb = jnp.dot(x.astype(jnp.bfloat16), we_ref[...],
                  preferred_element_type=jnp.float32) + be   # (TM, P)

    # LayerNorm1 over the *virtual* concat [x, emb] (never materialized), ReLU.
    inv_d = 1.0 / dcat
    mu = (jnp.sum(x, -1, keepdims=True) + jnp.sum(emb, -1, keepdims=True)) * inv_d
    xc = x - mu
    ec = emb - mu
    var = (jnp.sum(xc * xc, -1, keepdims=True)
           + jnp.sum(ec * ec, -1, keepdims=True)) * inv_d
    rstd = lax.rsqrt(var + LN_EPS)                           # EUP slot
    hx = jnp.maximum(xc * rstd * g1x + b1x, 0.0)             # (TM, Din)
    he = jnp.maximum(ec * rstd * g1e + b1e, 0.0)             # (TM, P)

    # Batch-invariant attention-map contribution: broadcast the (S, Dout) block
    # to the whole row tile on-chip instead of streaming a replicated copy.
    mb = mb_ref[...]
    if mb_reps > 1:
        mb = jnp.tile(mb, (mb_reps, 1))                      # (TM, Dout)

    # Linear1 without the second concat: split-K matmuls + map contribution.
    y = (jnp.dot(hx.astype(jnp.bfloat16), w1x_ref[...],
                 preferred_element_type=jnp.float32)
         + jnp.dot(he.astype(jnp.bfloat16), w1e_ref[...],
                   preferred_element_type=jnp.float32)
         + mb)                                               # (TM, Dout)

    # LayerNorm2 + ReLU (f32 math).
    mu2 = jnp.mean(y, -1, keepdims=True)
    yc = y - mu2
    var2 = jnp.mean(yc * yc, -1, keepdims=True)
    y = yc * lax.rsqrt(var2 + LN_EPS) * g2 + b2
    o_ref[...] = jnp.maximum(y, 0.0).astype(o_ref.dtype)


def _pick_tile_m(m, s, cap=512):
    """Pick a row-tile size tm that (a) divides M, (b) is compatible with the
    un-replicated map_bias (tm % S == 0 or S % tm == 0), (c) prefers large
    tiles (<= cap) and only uses >=2 grid tiles when tm can stay >= 128."""
    cands = [t for t in range(1, m + 1)
             if m % t == 0 and (t % s == 0 or s % t == 0)]
    aligned = [t for t in cands if t % 8 == 0]
    if aligned:
        cands = aligned
    small = [t for t in cands if t <= cap]
    if not small:
        return max(cands)
    two = [t for t in small if (m // t) >= 2 and t >= 128]
    return max(two) if two else max(small)


def _vmem_estimate_bytes(tm, din, p, dout, dmax, s, mb_const):
    f32, bf16 = 4, 2
    stream = 2 * tm * din * f32 + 2 * tm * dout * f32           # x + out, dbl-buffered
    mb = (s * dout * f32) if mb_const else (2 * tm * dout * f32)
    weights = (din * p + din * dout + p * dout) * bf16           # single-buffered
    vecs = 8 * dmax * f32
    interm = tm * (din + 2 * p + 2 * dout) * f32                 # emb/hx/he/y slabs
    interm += tm * (din + p) * bf16                              # bf16 casts
    return stream + mb + weights + vecs + 2 * interm


def input_embedding_forward(x_nchw, params, *, seq_len, input_dim,
                            out_dtype=jnp.float32):
    """x_nchw: (B, C, H, W) float32.  Returns (B, seq_len, out_dim)."""
    we, be, g1, b1, attn_map, w1, bl1, g2, b2 = params
    B = x_nchw.shape[0]
    S, Din = seq_len, input_dim
    P = we.shape[1]
    Dmap = attn_map.shape[-1]
    Dcat1 = Din + P
    Dout = w1.shape[1]
    M = B * S

    # Loud shape checks: the kernel assumes lane-dense 128-multiples and that
    # the NCHW flatten matches seq_len * input_dim.
    assert math.prod(x_nchw.shape) == M * Din, "C*H*W must equal seq_len*input_dim"
    for name, d in (("input_dim", Din), ("position_embedding_dim", P),
                    ("map_dim", Dmap), ("out_embedding_dim", Dout)):
        assert d % 128 == 0, f"{name}={d} must be a multiple of 128 (pad in caller)"

    # Glue (same reshapes the PyTorch forward does), batch folded into rows.
    x = x_nchw.reshape(M, Din)

    # Batch-invariant attention-map projection + linear1 bias (S, Dout).
    # NOT replicated per batch: the kernel broadcasts / modulo-indexes it.
    map_bias = jnp.dot(attn_map, w1[Dcat1:]) + bl1               # (S, Dout)

    # bf16 MXU operands (kernel requests f32 accumulation).
    we_bf = we.astype(jnp.bfloat16)
    w1x_bf = w1[:Din].astype(jnp.bfloat16)
    w1e_bf = w1[Din:Dcat1].astype(jnp.bfloat16)

    # Pack the small per-feature vectors into one (8, Dmax) block (1 DMA stream).
    Dmax = max(P, Dcat1, Dout)
    pk = jnp.zeros((8, Dmax), jnp.float32)
    pk = pk.at[_ROW_BE, :P].set(be.reshape(-1))
    pk = pk.at[_ROW_G1, :Dcat1].set(g1.reshape(-1))
    pk = pk.at[_ROW_B1, :Dcat1].set(b1.reshape(-1))
    pk = pk.at[_ROW_G2, :Dout].set(g2.reshape(-1))
    pk = pk.at[_ROW_B2, :Dout].set(b2.reshape(-1))

    tm = _pick_tile_m(M, S)
    grid = (M // tm,)

    const_spec = functools.partial(pl.BlockSpec, pipeline_mode=pl.Buffered(1))

    if tm % S == 0:
        # Constant (S, Dout) block; kernel broadcasts it to (tm, Dout) on-chip.
        mb_reps = tm // S
        mb_spec = const_spec((S, Dout), lambda i: (0, 0))
        mb_const = True
    else:
        # S % tm == 0 (guaranteed by _pick_tile_m): modulo-index the (S, Dout)
        # array so each grid step streams only the rows it needs.
        assert S % tm == 0
        nrep = S // tm
        mb_reps = 1
        mb_spec = pl.BlockSpec((tm, Dout), lambda i: (i % nrep, 0))
        mb_const = False

    est = _vmem_estimate_bytes(tm, Din, P, Dout, Dmax, S, mb_const)
    vmem_limit = int(min(max(est + (8 << 20), 32 << 20), 64 << 20))

    cost = pl.CostEstimate(
        flops=2 * M * (Din * P + (Din + P) * Dout),
        transcendentals=2 * M,
        bytes_accessed=(M * Din + M * Dout + S * Dout + 8 * Dmax) * 4
        + (Din * P + Din * Dout + P * Dout) * 2,
    )

    kernel = functools.partial(input_embedding_kernel,
                               din=Din, p=P, dout=Dout, mb_reps=mb_reps)
    out = pl.pallas_call(
        kernel,
        out_shape=jax.ShapeDtypeStruct((M, Dout), out_dtype),
        grid_spec=pltpu.PrefetchScalarGridSpec(
            num_scalar_prefetch=0,
            grid=grid,
            in_specs=[
                pl.BlockSpec((tm, Din), lambda i: (i, 0)),            # x rows
                const_spec((Din, P), lambda i: (0, 0)),               # we   (bf16)
                const_spec((Din, Dout), lambda i: (0, 0)),            # w1_x (bf16)
                const_spec((P, Dout), lambda i: (0, 0)),              # w1_e (bf16)
                mb_spec,                                               # map bias
                const_spec((8, Dmax), lambda i: (0, 0)),              # packed vecs
            ],
            out_specs=pl.BlockSpec((tm, Dout), lambda i: (i, 0)),
        ),
        compiler_params=pltpu.CompilerParams(
            dimension_semantics=("parallel",),
            vmem_limit_bytes=vmem_limit),
        cost_estimate=cost,
    )(x, we_bf, w1x_bf, w1e_bf, map_bias, pk)
    return out.reshape(B, S, Dout)


def _mm(a, b, bf16):
    if bf16:
        a = a.astype(jnp.bfloat16)
        b = b.astype(jnp.bfloat16)
    return jnp.dot(a, b, preferred_element_type=jnp.float32)


def reference_forward(x_nchw, params, *, seq_len, input_dim, bf16_matmul=False):
    """Pure-JAX reference mirroring the PyTorch module.

    With bf16_matmul=True it mirrors the kernel's numeric path (bf16 MXU
    operands, f32 accumulation, split second matmul, f32 map projection)."""
    we, be, g1, b1, attn_map, w1, bl1, g2, b2 = params
    B = x_nchw.shape[0]
    Din = input_dim
    P = we.shape[1]
    Dcat1 = Din + P
    x = x_nchw.reshape(B * seq_len, Din)

    emb = _mm(x, we, bf16_matmul) + be
    h = jnp.concatenate([x, emb], axis=-1)
    h = _layernorm(h, g1, b1)
    h = jnp.maximum(h, 0.0)

    m = jnp.tile(attn_map, (B, 1))
    if bf16_matmul:
        y = (_mm(h[:, :Din], w1[:Din], True)
             + _mm(h[:, Din:], w1[Din:Dcat1], True)
             + _mm(m, w1[Dcat1:], False) + bl1)
    else:
        h2 = jnp.concatenate([h, m], axis=-1)
        y = _mm(h2, w1, False) + bl1
    y = _layernorm(y, g2, b2)
    return jnp.maximum(y, 0.0).reshape(B, seq_len, -1)


if __name__ == "__main__":
    # Module hyper-params (picked so that B*C*H*W == B*seq_len*input_dim).
    B, C, H, W = 2, 4, 16, 16
    seq_len = 8
    input_dim = 128                 # 4*16*16 == 8*128
    position_embedding_dim = 128
    map_dim = 128
    out_embedding_dim = 128

    key = jax.random.PRNGKey(0)
    ks = jax.random.split(key, 11)

    x = jax.random.normal(ks[0], (B, C, H, W), dtype=jnp.float32)

    # Deterministic parameter init (synthetic, not a checkpoint).
    we = 0.05 * jax.random.normal(ks[1], (input_dim, position_embedding_dim), jnp.float32)
    be = 0.05 * jax.random.normal(ks[2], (1, position_embedding_dim), jnp.float32)
    g1 = 1.0 + 0.05 * jax.random.normal(ks[3], (1, input_dim + position_embedding_dim), jnp.float32)
    b1 = 0.05 * jax.random.normal(ks[4], (1, input_dim + position_embedding_dim), jnp.float32)
    attn_map = jax.random.normal(ks[5], (seq_len, map_dim), jnp.float32)
    w1 = 0.05 * jax.random.normal(
        ks[6], (input_dim + position_embedding_dim + map_dim, out_embedding_dim), jnp.float32)
    bl1 = 0.05 * jax.random.normal(ks[7], (1, out_embedding_dim), jnp.float32)
    g2 = 1.0 + 0.05 * jax.random.normal(ks[8], (1, out_embedding_dim), jnp.float32)
    b2 = 0.05 * jax.random.normal(ks[9], (1, out_embedding_dim), jnp.float32)

    params = (we, be, g1, b1, attn_map, w1, bl1, g2, b2)

    run = jax.jit(functools.partial(
        input_embedding_forward, seq_len=seq_len, input_dim=input_dim))
    out = run(x, params)
    out = jax.block_until_ready(out)
    assert out.shape == (B, seq_len, out_embedding_dim)

    # Tight check vs. a reference that mirrors the kernel's bf16-operand path.
    ref_bf16 = reference_forward(x, params, seq_len=seq_len,
                                 input_dim=input_dim, bf16_matmul=True)
    assert jnp.allclose(out, ref_bf16, atol=5e-4, rtol=5e-4), "mismatch vs bf16-path reference"

    # Loose sanity check vs. the pure-f32 reference (guards against gross bugs;
    # bf16 MXU operands introduce ~1e-3 level relative differences by design).
    ref_f32 = reference_forward(x, params, seq_len=seq_len, input_dim=input_dim)
    assert jnp.allclose(out, ref_f32, atol=5e-2, rtol=5e-2), "mismatch vs f32 reference"

    print("KERNEL_OK")
</pallas_src>

<mosaic_0001>
module attributes {stable_mosaic.version = 11 : i64} {
  func.func @input_embedding_kernel(%arg0: i32, %arg1: memref<16x128xf32, #tpu.memory_space<vmem>>, %arg2: memref<128x128xbf16, #tpu.memory_space<vmem>>, %arg3: memref<128x128xbf16, #tpu.memory_space<vmem>>, %arg4: memref<128x128xbf16, #tpu.memory_space<vmem>>, %arg5: memref<8x128xf32, #tpu.memory_space<vmem>>, %arg6: memref<8x256xf32, #tpu.memory_space<vmem>>, %arg7: memref<16x128xf32, #tpu.memory_space<vmem>>) attributes {dimension_semantics = [#tpu.dimension_semantics<parallel>], iteration_bounds = array<i64: 1>, scalar_prefetch = 0 : i64, scratch_operands = 0 : i64, tpu.core_type = #tpu.core_type<tc>, window_params = [{transform_indices = @transform_0, window_bounds = array<i64: 16, 128>}, {pipeline_mode = #tpu.pipeline_mode<synchronous>, transform_indices = @transform_1, window_bounds = array<i64: 128, 128>}, {pipeline_mode = #tpu.pipeline_mode<synchronous>, transform_indices = @transform_2, window_bounds = array<i64: 128, 128>}, {pipeline_mode = #tpu.pipeline_mode<synchronous>, transform_indices = @transform_3, window_bounds = array<i64: 128, 128>}, {pipeline_mode = #tpu.pipeline_mode<synchronous>, transform_indices = @transform_4, window_bounds = array<i64: 8, 128>}, {pipeline_mode = #tpu.pipeline_mode<synchronous>, transform_indices = @transform_5, window_bounds = array<i64: 8, 256>}, {transform_indices = @transform_6, window_bounds = array<i64: 16, 128>}]} {
    %c0 = arith.constant 0 : index
    %c0_0 = arith.constant 0 : index
    %0 = vector.load %arg1[%c0, %c0_0] : memref<16x128xf32, #tpu.memory_space<vmem>>, vector<16x128xf32>
    %c0_1 = arith.constant 0 : index
    %c0_2 = arith.constant 0 : index
    %1 = vector.load %arg6[%c0_1, %c0_2] : memref<8x256xf32, #tpu.memory_space<vmem>>, vector<1x128xf32>
    %c1 = arith.constant 1 : index
    %c0_3 = arith.constant 0 : index
    %2 = vector.load %arg6[%c1, %c0_3] : memref<8x256xf32, #tpu.memory_space<vmem>>, vector<1x128xf32>
    %c1_4 = arith.constant 1 : index
    %c128 = arith.constant 128 : index
    %3 = vector.load %arg6[%c1_4, %c128] : memref<8x256xf32, #tpu.memory_space<vmem>>, vector<1x128xf32>
    %c2 = arith.constant 2 : index
    %c0_5 = arith.constant 0 : index
    %4 = vector.load %arg6[%c2, %c0_5] : memref<8x256xf32, #tpu.memory_space<vmem>>, vector<1x128xf32>
    %c2_6 = arith.constant 2 : index
    %c128_7 = arith.constant 128 : index
    %5 = vector.load %arg6[%c2_6, %c128_7] : memref<8x256xf32, #tpu.memory_space<vmem>>, vector<1x128xf32>
    %c3 = arith.constant 3 : index
    %c0_8 = arith.constant 0 : index
    %6 = vector.load %arg6[%c3, %c0_8] : memref<8x256xf32, #tpu.memory_space<vmem>>, vector<1x128xf32>
    %c4 = arith.constant 4 : index
    %c0_9 = arith.constant 0 : index
    %7 = vector.load %arg6[%c4, %c0_9] : memref<8x256xf32, #tpu.memory_space<vmem>>, vector<1x128xf32>
    %8 = arith.truncf %0 : vector<16x128xf32> to vector<16x128xbf16>
    %c0_10 = arith.constant 0 : index
    %c0_11 = arith.constant 0 : index
    %9 = vector.load %arg2[%c0_10, %c0_11] : memref<128x128xbf16, #tpu.memory_space<vmem>>, vector<128x128xbf16>
    %cst = arith.constant dense<0.000000e+00> : vector<16x128xf32>
    %10 = tpu.matmul %8, %9, %cst {dimension_numbers = #tpu.dot_dimension_numbers<[1], [0], [0], [1], [0, 0, 1, 1], [], []>} : vector<16x128xbf16>, vector<128x128xbf16>, vector<16x128xf32> -> vector<16x128xf32>
    %11 = vector.broadcast %1 : vector<1x128xf32> to vector<16x128xf32>
    %12 = arith.addf %10, %11 : vector<16x128xf32>
    %cst_12 = arith.constant dense<0.000000e+00> : vector<16xf32>
    %13 = vector.multi_reduction <add>, %0, %cst_12 [1] : vector<16x128xf32> to vector<16xf32>
    %14 = vector.shape_cast %13 : vector<16xf32> to vector<16x1xf32>
    %cst_13 = arith.constant dense<0.000000e+00> : vector<16xf32>
    %15 = vector.multi_reduction <add>, %12, %cst_13 [1] : vector<16x128xf32> to vector<16xf32>
    %16 = vector.shape_cast %15 : vector<16xf32> to vector<16x1xf32>
    %17 = arith.addf %14, %16 : vector<16x1xf32>
    %cst_14 = arith.constant 3.906250e-03 : f32
    %18 = vector.broadcast %cst_14 : f32 to vector<16x1xf32>
    %19 = arith.mulf %17, %18 : vector<16x1xf32>
    %20 = vector.broadcast %19 : vector<16x1xf32> to vector<16x128xf32>
    %21 = arith.subf %0, %20 : vector<16x128xf32>
    %22 = vector.broadcast %19 : vector<16x1xf32> to vector<16x128xf32>
    %23 = arith.subf %12, %22 : vector<16x128xf32>
    %24 = arith.mulf %21, %21 : vector<16x128xf32>
    %cst_15 = arith.constant dense<0.000000e+00> : vector<16xf32>
    %25 = vector.multi_reduction <add>, %24, %cst_15 [1] : vector<16x128xf32> to vector<16xf32>
    %26 = vector.shape_cast %25 : vector<16xf32> to vector<16x1xf32>
    %27 = arith.mulf %23, %23 : vector<16x128xf32>
    %cst_16 = arith.constant dense<0.000000e+00> : vector<16xf32>
    %28 = vector.multi_reduction <add>, %27, %cst_16 [1] : vector<16x128xf32> to vector<16xf32>
    %29 = vector.shape_cast %28 : vector<16xf32> to vector<16x1xf32>
    %30 = arith.addf %26, %29 : vector<16x1xf32>
    %cst_17 = arith.constant 3.906250e-03 : f32
    %31 = vector.broadcast %cst_17 : f32 to vector<16x1xf32>
    %32 = arith.mulf %30, %31 : vector<16x1xf32>
    %cst_18 = arith.constant 9.99999974E-6 : f32
    %33 = vector.broadcast %cst_18 : f32 to vector<16x1xf32>
    %34 = arith.addf %32, %33 : vector<16x1xf32>
    %35 = math.rsqrt %34 : vector<16x1xf32>
    %36 = vector.broadcast %35 : vector<16x1xf32> to vector<16x128xf32>
    %37 = arith.mulf %21, %36 : vector<16x128xf32>
    %38 = vector.broadcast %2 : vector<1x128xf32> to vector<16x128xf32>
    %39 = arith.mulf %37, %38 : vector<16x128xf32>
    %40 = vector.broadcast %4 : vector<1x128xf32> to vector<16x128xf32>
    %41 = arith.addf %39, %40 : vector<16x128xf32>
    %cst_19 = arith.constant 0.000000e+00 : f32
    %42 = vector.broadcast %cst_19 : f32 to vector<16x128xf32>
    %43 = arith.maximumf %41, %42 : vector<16x128xf32>
    %44 = vector.broadcast %35 : vector<16x1xf32> to vector<16x128xf32>
    %45 = arith.mulf %23, %44 : vector<16x128xf32>
    %46 = vector.broadcast %3 : vector<1x128xf32> to vector<16x128xf32>
    %47 = arith.mulf %45, %46 : vector<16x128xf32>
    %48 = vector.broadcast %5 : vector<1x128xf32> to vector<16x128xf32>
    %49 = arith.addf %47, %48 : vector<16x128xf32>
    %cst_20 = arith.constant 0.000000e+00 : f32
    %50 = vector.broadcast %cst_20 : f32 to vector<16x128xf32>
    %51 = arith.maximumf %49, %50 : vector<16x128xf32>
    %c0_21 = arith.constant 0 : index
    %c0_22 = arith.constant 0 : index
    %52 = vector.load %arg5[%c0_21, %c0_22] : memref<8x128xf32, #tpu.memory_space<vmem>>, vector<8x128xf32>
    %53 = tpu.concatenate %52, %52 in 0 : vector<8x128xf32>, vector<8x128xf32> -> vector<16x128xf32>
    %54 = arith.truncf %43 : vector<16x128xf32> to vector<16x128xbf16>
    %c0_23 = arith.constant 0 : index
    %c0_24 = arith.constant 0 : index
    %55 = vector.load %arg3[%c0_23, %c0_24] : memref<128x128xbf16, #tpu.memory_space<vmem>>, vector<128x128xbf16>
    %cst_25 = arith.constant dense<0.000000e+00> : vector<16x128xf32>
    %56 = tpu.matmul %54, %55, %cst_25 {dimension_numbers = #tpu.dot_dimension_numbers<[1], [0], [0], [1], [0, 0, 1, 1], [], []>} : vector<16x128xbf16>, vector<128x128xbf16>, vector<16x128xf32> -> vector<16x128xf32>
    %57 = arith.truncf %51 : vector<16x128xf32> to vector<16x128xbf16>
    %c0_26 = arith.constant 0 : index
    %c0_27 = arith.constant 0 : index
    %58 = vector.load %arg4[%c0_26, %c0_27] : memref<128x128xbf16, #tpu.memory_space<vmem>>, vector<128x128xbf16>
    %cst_28 = arith.constant dense<0.000000e+00> : vector<16x128xf32>
    %59 = tpu.matmul %57, %58, %cst_28 {dimension_numbers = #tpu.dot_dimension_numbers<[1], [0], [0], [1], [0, 0, 1, 1], [], []>} : vector<16x128xbf16>, vector<128x128xbf16>, vector<16x128xf32> -> vector<16x128xf32>
    %60 = arith.addf %56, %59 : vector<16x128xf32>
    %61 = arith.addf %60, %53 : vector<16x128xf32>
    %cst_29 = arith.constant dense<0.000000e+00> : vector<16xf32>
    %62 = vector.multi_reduction <add>, %61, %cst_29 [1] : vector<16x128xf32> to vector<16xf32>
    %63 = vector.shape_cast %62 : vector<16xf32> to vector<16x1xf32>
    %cst_30 = arith.constant 1.280000e+02 : f32
    %64 = vector.broadcast %cst_30 : f32 to vector<16x1xf32>
    %65 = arith.divf %63, %64 : vector<16x1xf32>
    %66 = vector.broadcast %65 : vector<16x1xf32> to vector<16x128xf32>
    %67 = arith.subf %61, %66 : vector<16x128xf32>
    %68 = arith.mulf %67, %67 : vector<16x128xf32>
    %cst_31 = arith.constant dense<0.000000e+00> : vector<16xf32>
    %69 = vector.multi_reduction <add>, %68, %cst_31 [1] : vector<16x128xf32> to vector<16xf32>
    %70 = vector.shape_cast %69 : vector<16xf32> to vector<16x1xf32>
    %cst_32 = arith.constant 1.280000e+02 : f32
    %71 = vector.broadcast %cst_32 : f32 to vector<16x1xf32>
    %72 = arith.divf %70, %71 : vector<16x1xf32>
    %cst_33 = arith.constant 9.99999974E-6 : f32
    %73 = vector.broadcast %cst_33 : f32 to vector<16x1xf32>
    %74 = arith.addf %72, %73 : vector<16x1xf32>
    %75 = math.rsqrt %74 : vector<16x1xf32>
    %76 = vector.broadcast %75 : vector<16x1xf32> to vector<16x128xf32>
    %77 = arith.mulf %67, %76 : vector<16x128xf32>
    %78 = vector.broadcast %6 : vector<1x128xf32> to vector<16x128xf32>
    %79 = arith.mulf %77, %78 : vector<16x128xf32>
    %80 = vector.broadcast %7 : vector<1x128xf32> to vector<16x128xf32>
    %81 = arith.addf %79, %80 : vector<16x128xf32>
    %cst_34 = arith.constant 0.000000e+00 : f32
    %82 = vector.broadcast %cst_34 : f32 to vector<16x128xf32>
    %83 = arith.maximumf %81, %82 : vector<16x128xf32>
    %c0_35 = arith.constant 0 : index
    %c0_36 = arith.constant 0 : index
    %84 = vector.load %arg7[%c0_35, %c0_36] : memref<16x128xf32, #tpu.memory_space<vmem>>, vector<16x128xf32>
    tpu.vector_store %arg7[%c0_35, %c0_36], %83 {strides = array<i32>} : memref<16x128xf32, #tpu.memory_space<vmem>>, vector<16x128xf32>,
    return
  }
  func.func @transform_0(%arg0: i32) -> (i32, i32) {
    %c0_i32 = arith.constant 0 : i32
    %c0_i32_0 = arith.constant 0 : i32
    return %arg0, %c0_i32 : i32, i32
  }
  func.func @transform_1(%arg0: i32) -> (i32, i32) {
    %c0_i32 = arith.constant 0 : i32
    %c0_i32_0 = arith.constant 0 : i32
    %c0_i32_1 = arith.constant 0 : i32
    return %c0_i32, %c0_i32_0 : i32, i32
  }
  func.func @transform_2(%arg0: i32) -> (i32, i32) {
    %c0_i32 = arith.constant 0 : i32
    %c0_i32_0 = arith.constant 0 : i32
    %c0_i32_1 = arith.constant 0 : i32
    return %c0_i32, %c0_i32_0 : i32, i32
  }
  func.func @transform_3(%arg0: i32) -> (i32, i32) {
    %c0_i32 = arith.constant 0 : i32
    %c0_i32_0 = arith.constant 0 : i32
    %c0_i32_1 = arith.constant 0 : i32
    return %c0_i32, %c0_i32_0 : i32, i32
  }
  func.func @transform_4(%arg0: i32) -> (i32, i32) {
    %c0_i32 = arith.constant 0 : i32
    %c0_i32_0 = arith.constant 0 : i32
    %c0_i32_1 = arith.constant 0 : i32
    return %c0_i32, %c0_i32_0 : i32, i32
  }
  func.func @transform_5(%arg0: i32) -> (i32, i32) {
    %c0_i32 = arith.constant 0 : i32
    %c0_i32_0 = arith.constant 0 : i32
    %c0_i32_1 = arith.constant 0 : i32
    return %c0_i32, %c0_i32_0 : i32, i32
  }
  func.func @transform_6(%arg0: i32) -> (i32, i32) {
    %c0_i32 = arith.constant 0 : i32
    %c0_i32_0 = arith.constant 0 : i32
    return %arg0, %c0_i32 : i32, i32
  }
}

</mosaic_0001>

<bundles_post_ra>
// kernel: input_embedding_forward.1
= control target key start
LH: loop header
LB: loop body
LE: loop exit
PB: predicated region body
PF: predicated region fallthrough
CT: control target
= control target key end

     0   :  { %v624_v1 = vmov 0.0   ;;  %vm625_vm0 = vmmov 0   ;;  %s819_s0 = inlined_call_operand.vmem [shape: f32[16,128], index: 0, kind: input, shape index: {}]   ;;  %s820_s1 = inlined_call_operand.vmem [shape: bf16[128,128], index: 1, kind: input, shape index: {}]   ;;  %s821_s2 = inlined_call_operand.vmem [shape: bf16[128,128], index: 2, kind: input, shape index: {}]   ;;  %s822_s3 = inlined_call_operand.vmem [shape: bf16[128,128], index: 3, kind: input, shape index: {}]   ;;  %s823_s4 = inlined_call_operand.vmem [shape: f32[8,128], index: 4, kind: input, shape index: {}]   ;;  %s824_s5 = inlined_call_operand.vmem [shape: f32[8,256], index: 5, kind: input, shape index: {}]   ;;  %s825_s6 = inlined_call_operand.hbm [shape: f32[16,128], index: 6, kind: output, shape index: {}]  }
   0x1   :  { %v570_v0 = vld [vmem:[%s820_s1 + $0x38] sm:$0xff]   ;;  %505 = vmatprep.subr.bf16.mxu0 %v624_v1  ;;  %525 = vmatprep.subr.bf16.mxu1 %v624_v1  ;;  %v571_v2 = vld [vmem:[%s820_s1 + $0x30] sm:$0xff]   ;;  %v572_v3 = vld [vmem:[%s820_s1 + $0x28] sm:$0xff]  }
   0x2   :  { %506 = vmatpush3.bf16.msra.mxu0 %v570_v0  ;;  %521 = vmatprep.mubr.msk.bf16.mxu0 %vm625_vm0, %v624_v1  ;;  %v573_v4 = vld [vmem:[%s820_s1 + $0x20] sm:$0xff]   ;;  %v26_v6 = vld [vmem:[%s819_s0 + $0x8] sm:$0xff]  ;;  %v574_v7 = vld [vmem:[%s820_s1 + $0x18] sm:$0xff]  }
   0x3   :  { %507 = vmatprep.subr.bf16.mxu0 %v624_v1  ;;  %541 = vmatprep.mubr.msk.bf16.mxu1 %vm625_vm0, %v624_v1  ;;  %v25_v5 = vld [vmem:[%s819_s0] sm:$0xff]  ;;  %v575_v8 = vld [vmem:[%s820_s1 + $0x10] sm:$0xff]  }
   0x4   :  { %140 = vadd.xlane.f32.xlu0 %v25_v5 }
   0x6   :  { %508 = vmatpush3.bf16.msra.mxu0 %v571_v2 }
   0x7   :  { %509 = vmatprep.subr.bf16.mxu0 %v624_v1 }
   0x8   :  { %142 = vadd.xlane.f32.xlu0 %v26_v6 }
   0xa   :  { %510 = vmatpush3.bf16.msra.mxu0 %v572_v3 }
   0xb   :  { %511 = vmatprep.subr.bf16.mxu0 %v624_v1 }
   0xe   :  { %512 = vmatpush3.bf16.msra.mxu0 %v573_v4 }
   0xf   :  { %513 = vmatprep.subr.bf16.mxu0 %v624_v1 }
  0x12   :  { %514 = vmatpush3.bf16.msra.mxu0 %v574_v7 }
  0x13   :  { %515 = vmatprep.subr.bf16.mxu0 %v624_v1 }
  0x14   :  { %11 = vsyncpa [#allocation3], 0  ;;  %v576_v9 = vld [vmem:[%s820_s1 + $0x8] sm:$0xff]   ;;  %v577_v10 = vld [vmem:[%s820_s1] sm:$0xff]   ;;  %v34_v11 = vpack.c.bf16 %v26_v6, %v25_v5  ;;  %s626_s10 = smov [#allocation2]  }
  0x15   :  { %v27_v12 = vld [vmem:[%s824_s5] ss:$0 sm:$0xff]  ;;  %v578_v35 = vld [vmem:[%s822_s3 + $0x38] sm:$0xff]   ;;  %v580_v37 = vld [vmem:[%s822_s3 + $0x30] sm:$0xff]   ;;  %s443_s11 = sshll.u32 %s626_s10, 4  ;;  %s444_s11 = int_to_ptr.vmem [resolvable:$true] %s443_s11 }
  0x16   :  { %516 = vmatpush3.bf16.msra.mxu0 %v575_v8  ;;  %v579_v36 = vld [vmem:[%s821_s2 + $0x38] sm:$0xff]   ;;  %526 = vmatpush3.bf16.msra.mxu1 %v578_v35  ;;  %v581_v38 = vld [vmem:[%s821_s2 + $0x30] sm:$0xff]   ;;  %v582_v39 = vld [vmem:[%s822_s3 + $0x28] sm:$0xff]   ;;  %s602_s12 = scalar_lea.vmem %s444_s11, 256  ;;  %p607_p1 = scmp.lt.s32.totalorder %s444_s11, %s444_s11 }
  0x17   :  { %517 = vmatprep.subr.bf16.mxu0 %v624_v1  ;;  %527 = vmatprep.subr.bf16.mxu1 %v624_v1  ;;  %v583_v40 = vld [vmem:[%s821_s2 + $0x28] sm:$0xff]   ;;  %v584_v41 = vld [vmem:[%s822_s3 + $0x20] sm:$0xff]   ;;  %v586_v43 = vld [vmem:[%s822_s3 + $0x18] sm:$0xff]   ;;  %p603_p0 = scmp.ne.s32.totalorder %s444_s11, %s602_s12  ;;  %p608_p2 = scmp.lt.s32.totalorder %s602_s12, %s602_s12 }
  0x18   :  { %v585_v42 = vld [vmem:[%s821_s2 + $0x20] sm:$0xff]   ;;  %v587_v44 = vld [vmem:[%s821_s2 + $0x18] sm:$0xff]   ;;  %v588_v45 = vld [vmem:[%s822_s3 + $0x10] sm:$0xff]  }
  0x19   :  { %v589_v46 = vld [vmem:[%s821_s2 + $0x10] sm:$0xff]   ;;  %v590_v47 = vld [vmem:[%s822_s3 + $0x8] sm:$0xff]   ;;  %v592_v49 = vld [vmem:[%s822_s3] sm:$0xff]   ;;  %p609_p3 = por %p608_p2, %p607_p1 }
  0x1a   :  { %518 = vmatpush3.bf16.msra.mxu0 %v576_v9  ;;  %528 = vmatpush3.bf16.msra.mxu1 %v580_v37  ;;  %v591_v48 = vld [vmem:[%s821_s2 + $0x8] sm:$0xff]   ;;  %v593_v50 = vld [vmem:[%s821_s2] sm:$0xff]  }
  0x1b   :  { %519 = vmatprep.subr.bf16.mxu0 %v624_v1  ;;  %529 = vmatprep.subr.bf16.mxu1 %v624_v1  ;;  %v29_v62 = vld [vmem:[%s824_s5 + $0x9] ss:$0 sm:$0xff]  ;;  %v28_v63 = vld [vmem:[%s824_s5 + $0x1] ss:$0 sm:$0xff]  ;;  %p610_p4 = pnand %p609_p3, %p603_p0 }
  0x1e   :  { %520 = vmatpush3.bf16.msra.mxu0 %v577_v10  ;;  %530 = vmatpush3.bf16.msra.mxu1 %v582_v39 }
  0x1f   :  { %545 = vmatprep.subr.bf16.mxu0 %v624_v1  ;;  %531 = vmatprep.subr.bf16.mxu1 %v624_v1 }
  0x21   :  { %522 = vmatmul.mubr.bf16.vlgmr.msra.gmra.mxu0 %v34_v11 }
  0x22   :  { %561 = vmatprep.mubr.msk.bf16.mxu0 %vm625_vm0, %v624_v1  ;;  %546 = vmatpush3.bf16.msra.mxu0 %v579_v36 }
  0x23   :  { %547 = vmatprep.subr.bf16.mxu0 %v624_v1  ;;  %532 = vmatpush3.bf16.msra.mxu1 %v584_v41 }
  0x24   :  { %533 = vmatprep.subr.bf16.mxu1 %v624_v1 }
  0x26   :  { %548 = vmatpush3.bf16.msra.mxu0 %v581_v38 }
  0x27   :  { %549 = vmatprep.subr.bf16.mxu0 %v624_v1  ;;  %534 = vmatpush3.bf16.msra.mxu1 %v586_v43 }
  0x28   :  { %535 = vmatprep.subr.bf16.mxu1 %v624_v1 }
  0x2a   :  { %550 = vmatpush3.bf16.msra.mxu0 %v583_v40 }
  0x2b   :  { %551 = vmatprep.subr.bf16.mxu0 %v624_v1  ;;  %536 = vmatpush3.bf16.msra.mxu1 %v588_v45 }
  0x2c   :  { %537 = vmatprep.subr.bf16.mxu1 %v624_v1 }
  0x2e   :  { %552 = vmatpush3.bf16.msra.mxu0 %v585_v42 }
  0x2f   :  { %553 = vmatprep.subr.bf16.mxu0 %v624_v1  ;;  %538 = vmatpush3.bf16.msra.mxu1 %v590_v47 }
  0x30   :  { %539 = vmatprep.subr.bf16.mxu1 %v624_v1 }
  0x32   :  { %554 = vmatpush3.bf16.msra.mxu0 %v587_v44 }
  0x33   :  { %555 = vmatprep.subr.bf16.mxu0 %v624_v1  ;;  %540 = vmatpush3.bf16.msra.mxu1 %v592_v49  ;;  %v32_v49 = vld [vmem:[%s824_s5 + $0x3] ss:$0 sm:$0xff] }
  0x36   :  { %556 = vmatpush3.bf16.msra.mxu0 %v589_v46 }
  0x37   :  { %557 = vmatprep.subr.bf16.mxu0 %v624_v1 }
  0x3a   :  { %558 = vmatpush3.bf16.msra.mxu0 %v591_v48 }
  0x3b   :  { %559 = vmatprep.subr.bf16.mxu0 %v624_v1 }
  0x3e   :  { %560 = vmatpush3.bf16.msra.mxu0 %v593_v50 }
  0x8d   :  { %v141_v19 = vpop.xlane.xlu0 %140 }
  0x91   :  { %v143_v22 = vpop.xlane.xlu0 %142 }
  0xe1   :  { %v133_v13 = vpop.f32.mrf.mxu0 }
  0xe2   :  { %v134_v14 = vadd.f32 %v133_v13, %v27_v12 }
  0xe3   :  { %v523_v15 = vpop.f32.mrf.mxu0 }
  0xe4   :  { %144 = vadd.xlane.f32.xlu1 %v134_v14 }
  0xe5   :  { %v136_v16 = vpop.f32.mrf.mxu0 }
  0xe6   :  { %v137_v17 = vadd.f32 %v136_v16, %v27_v12 }
  0xe7   :  { %v524_v18 = vpop.f32.mrf.mxu0 }
  0xe8   :  { %146 = vadd.xlane.f32.xlu1 %v137_v17 }
 0x16d   :  { %v145_v20 = vpop.xlane.xlu1 %144 }
 0x16e   :  { %v148_v21 = vadd.f32 %v145_v20, %v141_v19 }
 0x170   :  { %v150_v23 = vmul.f32 0.00390625, %v148_v21 }
 0x171   :  { %v147_v24 = vpop.xlane.xlu1 %146 }
 0x172   :  { %v713_v25 = vsub.f32 %v25_v5, %v150_v23  ;;  %v149_v26 = vadd.f32 %v147_v24, %v143_v22  ;;  %v715_v27 = vsub.f32 %v134_v14, %v150_v23  ;;  %v31_v5 = vld [vmem:[%s824_s5 + $0xa] ss:$0 sm:$0xff]  ;;  %v192_v23 = vld [vmem:[%s823_s4] sm:$0xff] }
 0x174   :  { %v151_v28 = vmul.f32 0.00390625, %v149_v26  ;;  %v156_v29 = vmul.f32 %v713_v25, %v713_v25  ;;  %v162_v32 = vmul.f32 %v715_v27, %v715_v27 }
 0x176   :  { %v719_v30 = vsub.f32 %v26_v6, %v151_v28  ;;  %158 = vadd.xlane.f32.xlu0 %v156_v29  ;;  %v721_v31 = vsub.f32 %v137_v17, %v151_v28  ;;  %v30_v6 = vld [vmem:[%s824_s5 + $0x2] ss:$0 sm:$0xff] }
 0x178   :  { %v157_v33 = vmul.f32 %v719_v30, %v719_v30  ;;  %v163_v34 = vmul.f32 %v721_v31, %v721_v31 }
 0x17a   :  { %164 = vadd.xlane.f32.xlu0 %v162_v32  ;;  %160 = vadd.xlane.f32.xlu1 %v157_v33 }
 0x17e   :  { %166 = vadd.xlane.f32.xlu1 %v163_v34 }
 0x1ff   :  { %v159_v51 = vpop.xlane.xlu0 %158 }
 0x203   :  { %v165_v52 = vpop.xlane.xlu0 %164  ;;  %v161_v53 = vpop.xlane.xlu1 %160 }
 0x204   :  { %v168_v54 = vadd.f32 %v165_v52, %v159_v51  ;;  %v33_v51 = vld [vmem:[%s824_s5 + $0x4] ss:$0 sm:$0xff] }
 0x206   :  { %v170_v55 = vmul.f32 0.00390625, %v168_v54 }
 0x207   :  { %v167_v56 = vpop.xlane.xlu1 %166 }
 0x208   :  { %v172_v57 = vadd.f32 1e-05, %v170_v55  ;;  %v169_v58 = vadd.f32 %v167_v56, %v161_v53 }
 0x20a   :  { %594 = vrsqrt.f32 %v172_v57  ;;  %v171_v59 = vmul.f32 0.00390625, %v169_v58 }
 0x20c   :  { %v173_v60 = vadd.f32 1e-05, %v171_v59 }
 0x20e   :  { %596 = vrsqrt.f32 %v173_v60 }
 0x217   :  { %v595_v61 = vpop.eup %594 }
 0x218   :  { %v184_v0 = vmul.f32 %v595_v61, %v715_v27  ;;  %v176_v1 = vmul.f32 %v595_v61, %v713_v25 }
 0x21a   :  { %v186_v2 = vmul.f32 %v184_v0, %v29_v62  ;;  %v178_v3 = vmul.f32 %v176_v1, %v28_v63 }
 0x21b   :  { %v597_v4 = vpop.eup %596 }
 0x21c   :  { %v185_v7 = vmul.f32 %v597_v4, %v721_v31  ;;  %v177_v8 = vmul.f32 %v597_v4, %v719_v30  ;;  %v188_v10 = vadd.f32 %v186_v2, %v31_v5  ;;  %v180_v12 = vadd.f32 %v178_v3, %v30_v6 }
 0x21e   :  { %v187_v9 = vmul.f32 %v185_v7, %v29_v62  ;;  %v179_v11 = vmul.f32 %v177_v8, %v28_v63  ;;  %v190_v15 = vmax.f32 %v188_v10, 0.0  ;;  %v182_v17 = vmax.f32 %v180_v12, 0.0 }
 0x220   :  { %v189_v13 = vadd.f32 %v187_v9, %v31_v5  ;;  %v181_v14 = vadd.f32 %v179_v11, %v30_v6 }
 0x222   :  { %v191_v16 = vmax.f32 %v189_v13, 0.0  ;;  %v183_v18 = vmax.f32 %v181_v14, 0.0 }
 0x224   :  { %v210_v19 = vpack.c.bf16 %v191_v16, %v190_v15  ;;  %v193_v20 = vpack.c.bf16 %v183_v18, %v182_v17 }
 0x226   :  { %542 = vmatmul.mubr.bf16.vlgmr.msra.gmra.mxu1 %v210_v19  ;;  %562 = vmatmul.mubr.bf16.vlgmr.msra.gmra.mxu0 %v193_v20 }
 0x2e6   :  { %v309_v21 = vpop.f32.mrf.mxu1  ;;  %v398_v22 = vpop.f32.mrf.mxu0 }
 0x2e7   :  { %v399_v24 = vadd.f32 %v398_v22, %v309_v21 }
 0x2e8   :  { %v543_v25 = vpop.f32.mrf.mxu1  ;;  %v563_v26 = vpop.f32.mrf.mxu0 }
 0x2e9   :  { %v405_v27 = vadd.f32 %v399_v24, %v192_v23 }
 0x2ea   :  { %v312_v28 = vpop.f32.mrf.mxu1  ;;  %v401_v29 = vpop.f32.mrf.mxu0 }
 0x2eb   :  { %v402_v30 = vadd.f32 %v401_v29, %v312_v28  ;;  %407 = vadd.xlane.f32.xlu0 %v405_v27 }
 0x2ec   :  { %v544_v31 = vpop.f32.mrf.mxu1  ;;  %v564_v32 = vpop.f32.mrf.mxu0 }
 0x2ed   :  { %v406_v33 = vadd.f32 %v402_v30, %v192_v23 }
 0x2ef   :  { %409 = vadd.xlane.f32.xlu1 %v406_v33 }
 0x374   :  { %v408_v34 = vpop.xlane.xlu0 %407 }
 0x375   :  { %v412_v35 = vmul.f32 0.0078125, %v408_v34 }
 0x377   :  { %v414_v36 = vsub.f32 %v405_v27, %v412_v35 }
 0x378   :  { %v410_v37 = vpop.xlane.xlu1 %409 }
 0x379   :  { %v413_v38 = vmul.f32 0.0078125, %v410_v37  ;;  %v416_v39 = vmul.f32 %v414_v36, %v414_v36 }
 0x37b   :  { %v415_v40 = vsub.f32 %v406_v33, %v413_v38  ;;  %418 = vadd.xlane.f32.xlu0 %v416_v39 }
 0x37d   :  { %v417_v41 = vmul.f32 %v415_v40, %v415_v40 }
 0x37f   :  { %420 = vadd.xlane.f32.xlu1 %v417_v41 }
 0x404   :  { %v419_v42 = vpop.xlane.xlu0 %418 }
 0x405   :  { %v422_v43 = vmul.f32 0.0078125, %v419_v42 }
 0x407   :  { %v424_v44 = vadd.f32 1e-05, %v422_v43 }
 0x408   :  { %v421_v45 = vpop.xlane.xlu1 %420 }
 0x409   :  { %598 = vrsqrt.f32 %v424_v44  ;;  %v423_v46 = vmul.f32 0.0078125, %v421_v45 }
 0x40b   :  { %v425_v47 = vadd.f32 1e-05, %v423_v46 }
 0x40d   :  { %600 = vrsqrt.f32 %v425_v47 }
 0x416   :  { %v599_v48 = vpop.eup %598 }
 0x417   :  { %v428_v50 = vmul.f32 %v599_v48, %v414_v36 }
 0x419   :  { %v430_v52 = vmul.f32 %v428_v50, %v32_v49 }
 0x41a   :  { %v601_v53 = vpop.eup %600 }
 0x41b   :  { %v429_v54 = vmul.f32 %v601_v53, %v415_v40  ;;  %v432_v55 = vadd.f32 %v430_v52, %v33_v51 }
 0x41d   :  { %v431_v56 = vmul.f32 %v429_v54, %v32_v49  ;;  %v434_v57 = vmax.f32 %v432_v55, 0.0 }
 0x41f   :  { %v433_v58 = vadd.f32 %v431_v56, %v33_v51  ;;  %436 = vst [vmem:[#allocation2] sm:$0xff] %v434_v57 }
 0x421   :  { %v435_v59 = vmax.f32 %v433_v58, 0.0 }
 0x423   :  { %437 = vst [vmem:[#allocation2 + $0x8] sm:$0xff] %v435_v59 }
 0x424   :  { %613 = shalt.err (!%p610_p4)
}
 0x425   :  { %s627_s5 = smov 128   ;;  %s628_s0 = smov 8  }
 0x426   :  { %449 = dma.vmem_to_hbm [thread:$0]  %s444_s11, 256, %s825_s6, [#allocation3], %s627_s5, %s627_s5, %s628_s0  }
 0x427   :  { %622 = dma.done.wait [#allocation3], 256  }
 0x428   :  { %623 = vsyncadd [#allocation3], 4294967040 }
 0x429   :  { %453 = vsyncpa [#allocation3], 1 }

</bundles_post_ra>
